<compile_context>
chip_gen: v5e
topology: v5e:2x2
jax: 0.10.0
libtpu: 0.0.40
codegen_flags: <defaults>
</compile_context>

<pallas_src>
import jax
import jax.numpy as jnp
import numpy as np
from jax.experimental import pallas as pl
from jax.experimental.pallas import tpu as pltpu


def _dma_copy_kernel(x_hbm, o_hbm, sem):
    # One HBM -> HBM DMA of the full array; streams at HBM bandwidth on
    # v5e / v6e / v7x with zero VMEM staging and zero grid overhead.
    cp = pltpu.make_async_copy(x_hbm, o_hbm, sem)
    cp.start()
    cp.wait()


def _pallas_identity(x):
    """Identity of an arbitrary-shape array via a single HBM->HBM DMA."""
    if x.ndim == 0 or x.size == 0:
        # Nothing to DMA; the identity of a scalar / empty array is itself.
        return x

    nbytes = x.size * jnp.dtype(x.dtype).itemsize
    return pl.pallas_call(
        _dma_copy_kernel,
        out_shape=jax.ShapeDtypeStruct(x.shape, x.dtype),
        in_specs=[pl.BlockSpec(memory_space=pl.ANY)],
        out_specs=pl.BlockSpec(memory_space=pl.ANY),
        scratch_shapes=[pltpu.SemaphoreType.DMA],
        cost_estimate=pl.CostEstimate(
            flops=0, transcendentals=0, bytes_accessed=2 * nbytes),
    )(x)


def empty_forward(*args):
    """Mirrors Empty.forward: identity on one arg, None on zero, tuple otherwise."""
    def passthrough(a):
        if isinstance(a, (jnp.ndarray, jax.Array)):
            return _pallas_identity(a)
        return a  # non-tensor arguments are returned as-is, like PyTorch does.

    if len(args) == 1:
        return passthrough(args[0])
    elif len(args) == 0:
        return None
    return tuple(passthrough(a) for a in args)


if __name__ == "__main__":
    key = jax.random.PRNGKey(0)
    N, C, H, W = 2, 4, 16, 16
    x = jax.random.normal(key, (N, C, H, W), jnp.float32)

    # Single-argument path: identity.
    out = jax.block_until_ready(empty_forward(x))
    assert out.shape == x.shape and out.dtype == x.dtype
    np.testing.assert_array_equal(np.asarray(out), np.asarray(x))

    # Zero-argument path: None.
    assert empty_forward() is None

    # Multi-argument path: tuple of the inputs (mixed dtypes / shapes).
    y = jax.random.normal(jax.random.PRNGKey(1), (8, 32), jnp.float32)
    z = jax.random.normal(jax.random.PRNGKey(2), (16, 128), jnp.bfloat16)
    multi = empty_forward(x, y, z)
    assert isinstance(multi, tuple) and len(multi) == 3
    multi = jax.block_until_ready(multi)
    np.testing.assert_array_equal(np.asarray(multi[0]), np.asarray(x))
    np.testing.assert_array_equal(np.asarray(multi[1]), np.asarray(y))
    np.testing.assert_array_equal(np.asarray(multi[2]), np.asarray(z))
    assert multi[2].dtype == jnp.bfloat16

    print("KERNEL_OK")
</pallas_src>

<mosaic_0001>
module attributes {stable_mosaic.version = 11 : i64} {
  func.func @_dma_copy_kernel(%arg0: memref<2x4x16x16xf32, #tpu.memory_space<any>>, %arg1: memref<2x4x16x16xf32, #tpu.memory_space<any>>, %arg2: memref<!tpu.dma_semaphore, #tpu.memory_space<semaphore_mem>>) attributes {dimension_semantics = [], scalar_prefetch = 0 : i64, scratch_operands = 1 : i64, tpu.core_type = #tpu.core_type<tc>} {
    tpu.enqueue_dma source(%arg0 : memref<2x4x16x16xf32, #tpu.memory_space<any>>) target(%arg1 : memref<2x4x16x16xf32, #tpu.memory_space<any>>) target_semaphore(%arg2 : memref<!tpu.dma_semaphore, #tpu.memory_space<semaphore_mem>>)
    tpu.wait_dma2 semaphore(%arg2 : memref<!tpu.dma_semaphore, #tpu.memory_space<semaphore_mem>>) src(%arg0 : memref<2x4x16x16xf32, #tpu.memory_space<any>>) dst(%arg1 : memref<2x4x16x16xf32, #tpu.memory_space<any>>)
    return
  }
}

</mosaic_0001>

<bundles_post_ra>
// kernel: tpu_custom_call.1
= control target key start
LH: loop header
LB: loop body
LE: loop exit
PB: predicated region body
PF: predicated region fallthrough
CT: control target
= control target key end

     0   :  { %s34_s12 = smov [#allocation2]   ;;  %s35_s13 = smov [#allocation3]   ;;  %s53_s0 = inlined_call_operand.hbm [shape: f32[2,4,16,16], index: 0, kind: input, shape index: {}]   ;;  %s54_s1 = inlined_call_operand.hbm [shape: f32[2,4,16,16], index: 1, kind: output, shape index: {}]  }
   0x1   :  { %s10_s8 = sshll.u32 %s53_s0, 4  ;;  %s12_s11 = sshll.u32 %s54_s1, 4  ;;  %s11_s8 = int_to_ptr.hbm [resolvable:$true] %s10_s8  ;;  %s13_s11 = int_to_ptr.hbm [resolvable:$true] %s12_s11 }
   0x2   :  { %s36_s14 = smov 0  }
   0x3   :  { %16 = dma.general %s11_s8, 2048, %s13_s11, %s34_s12, %s35_s13, [#allocation4], %s36_s14, 0  }
   0x4   :  { %32 = dma.done.wait [#allocation2], 2048 }
   0x5   :  { %33 = vsyncadd [#allocation2], 4294965248 }
   0x6   :  { %22 = vsyncmov [#allocation2] }
   0x9   :  { %s23_s15 = vpop.sfrf %22 }
   0xa   :  { %p28_p0 = scmp.ne.s32.totalorder %s23_s15, 0 }
   0xc   :  { %27 = shalt.err (%p28_p0)  }

</bundles_post_ra>
